<compile_context>
chip_gen: v5e
topology: v5e:2x2
jax: 0.10.0
libtpu: 0.0.40
codegen_flags: <defaults>
</compile_context>

<pallas_src>
import functools
import math

import numpy as np
import jax
import jax.numpy as jnp
from jax.experimental import pallas as pl
from jax.experimental.pallas import tpu as pltpu

CFG = dict(
    num_channels=32,
    hidden_sizes=[64, 128, 320, 512],
    depths=[3, 6, 40, 3],
    num_heads=[1, 2, 5, 8],
    sr_ratios=[8, 4, 2, 1],
    patch_sizes=[7, 3, 3, 3],
    strides=[4, 2, 2, 2],
    mlp_ratio=4,
    decoder_hidden=768,
    num_labels=1,
)

LN_EPS = 1e-6  # HF Segformer layer_norm_eps


def _round_up(x, m):
    return (x + m - 1) // m * m


def _pick_tile(dim, candidates):
    for t in candidates:
        if dim % t == 0:
            return t
    return None


# ----------------------------------------------------------------------------
# Matmul with fused bias / ReLU / LayerNorm prologue-epilogue
# ----------------------------------------------------------------------------

def _matmul_kernel(*refs, act, has_ln_in, has_ln_out):
    idx = 0
    a_ref = refs[idx]; idx += 1
    b_ref = refs[idx]; idx += 1
    bias_ref = refs[idx]; idx += 1
    if has_ln_in:
        gi_ref, bi_ref = refs[idx], refs[idx + 1]; idx += 2
    if has_ln_out:
        go_ref, bo_ref = refs[idx], refs[idx + 1]; idx += 2
    o_ref = refs[idx]

    a = a_ref[...]
    if has_ln_in:  # row LayerNorm over K (K == full feature dim in the block)
        af = a.astype(jnp.float32)
        mu = jnp.mean(af, axis=-1, keepdims=True)
        xc = af - mu
        var = jnp.mean(xc * xc, axis=-1, keepdims=True)
        a = ((xc * jax.lax.rsqrt(var + LN_EPS)) * gi_ref[...]
             + bi_ref[...]).astype(jnp.bfloat16)

    acc = jnp.dot(a, b_ref[...], preferred_element_type=jnp.float32)
    acc = acc + bias_ref[...]
    if act == "relu":
        acc = jnp.maximum(acc, 0.0)
    if has_ln_out:  # row LayerNorm over N (only used with a full-N block)
        mu = jnp.mean(acc, axis=-1, keepdims=True)
        xc = acc - mu
        var = jnp.mean(xc * xc, axis=-1, keepdims=True)
        acc = (xc * jax.lax.rsqrt(var + LN_EPS)) * go_ref[...] + bo_ref[...]
    o_ref[...] = acc.astype(o_ref.dtype)


@functools.partial(jax.jit, static_argnames=("act", "out_dtype"))
def matmul_bias(a, b, bias, act="none", ln_in=None, ln_out=None,
                out_dtype=jnp.bfloat16):
    """(M, K) @ (K, N) + bias[N]; bf16 MXU operands, f32 accumulation.

    Optional fused row-LayerNorm on the input (`ln_in`) or output (`ln_out`)
    and fused ReLU."""
    M, K = a.shape
    K2, N = b.shape
    assert K == K2
    a = a.astype(jnp.bfloat16)
    b = b.astype(jnp.bfloat16)
    bias2 = bias.reshape(1, N).astype(jnp.float32)

    if M <= 256:
        tm, Mp = M, M
    else:
        tm = _pick_tile(M, (512, 256, 128))
        if tm is None:              # rare remainder path: pad M only (bf16)
            Mp = _round_up(M, 128)
            a = jnp.pad(a, ((0, Mp - M), (0, 0)))
            tm = 128
        else:
            Mp = M
    tn = N if N <= 512 else (_pick_tile(N, (512, 256, 128)) or N)
    if ln_out is not None:
        tn = N                      # epilogue LN needs the whole output row

    in_specs = [pl.BlockSpec((tm, K), lambda i, j: (i, 0)),
                pl.BlockSpec((K, tn), lambda i, j: (0, j)),
                pl.BlockSpec((1, tn), lambda i, j: (0, j))]
    args = [a, b, bias2]
    if ln_in is not None:
        g, be = ln_in
        in_specs += [pl.BlockSpec((1, K), lambda i, j: (0, 0)),
                     pl.BlockSpec((1, K), lambda i, j: (0, 0))]
        args += [g.reshape(1, K).astype(jnp.float32),
                 be.reshape(1, K).astype(jnp.float32)]
    if ln_out is not None:
        g, be = ln_out
        in_specs += [pl.BlockSpec((1, tn), lambda i, j: (0, j)),
                     pl.BlockSpec((1, tn), lambda i, j: (0, j))]
        args += [g.reshape(1, N).astype(jnp.float32),
                 be.reshape(1, N).astype(jnp.float32)]

    out = pl.pallas_call(
        functools.partial(_matmul_kernel, act=act,
                          has_ln_in=ln_in is not None,
                          has_ln_out=ln_out is not None),
        out_shape=jax.ShapeDtypeStruct((Mp, N), out_dtype),
        grid=(Mp // tm, N // tn),
        in_specs=in_specs,
        out_specs=pl.BlockSpec((tm, tn), lambda i, j: (i, j)),
        compiler_params=pltpu.CompilerParams(
            dimension_semantics=("parallel", "parallel")),
    )(*args)
    return out[:M] if Mp != M else out


# ----------------------------------------------------------------------------
# Fused attention: softmax(q k^T * scale) v, scores stay in VMEM
# ----------------------------------------------------------------------------

def _attn_kernel(q_ref, k_ref, v_ref, o_ref, *, scale):
    q = q_ref[0]
    k = k_ref[0]
    v = v_ref[0]
    s = jax.lax.dot_general(q, k, (((1,), (1,)), ((), ())),
                            preferred_element_type=jnp.float32) * scale
    m = jnp.max(s, axis=-1, keepdims=True)
    e = jnp.exp(s - m)
    probs = e * pl.reciprocal(jnp.sum(e, axis=-1, keepdims=True), approx=True)
    ctx = jnp.dot(probs.astype(jnp.bfloat16), v,
                  preferred_element_type=jnp.float32)
    o_ref[0] = ctx.astype(o_ref.dtype)


@functools.partial(jax.jit, static_argnames=("scale",))
def fused_attention(q, k, v, scale):
    """(G, N, dh) x (G, Nk, dh) -> (G, N, dh); one (batch*head) per grid step.
    TODO(synk): add flash-style online-softmax KV tiling for long sequences."""
    G, N, dh = q.shape
    _, Nk, _ = k.shape
    return pl.pallas_call(
        functools.partial(_attn_kernel, scale=scale),
        out_shape=jax.ShapeDtypeStruct((G, N, dh), jnp.bfloat16),
        grid=(G,),
        in_specs=[pl.BlockSpec((1, N, dh), lambda g: (g, 0, 0)),
                  pl.BlockSpec((1, Nk, dh), lambda g: (g, 0, 0)),
                  pl.BlockSpec((1, Nk, dh), lambda g: (g, 0, 0))],
        out_specs=pl.BlockSpec((1, N, dh), lambda g: (g, 0, 0)),
        compiler_params=pltpu.CompilerParams(dimension_semantics=("parallel",)),
    )(q.astype(jnp.bfloat16), k.astype(jnp.bfloat16), v.astype(jnp.bfloat16))


# ----------------------------------------------------------------------------
# Row-tiled LayerNorm (used where the LN output must be materialized)
# ----------------------------------------------------------------------------

def _layernorm_kernel(x_ref, g_ref, b_ref, o_ref, *, eps):
    x = x_ref[...].astype(jnp.float32)
    mu = jnp.mean(x, axis=-1, keepdims=True)
    xc = x - mu
    var = jnp.mean(xc * xc, axis=-1, keepdims=True)
    o_ref[...] = ((xc * jax.lax.rsqrt(var + eps)) * g_ref[...]
                  + b_ref[...]).astype(o_ref.dtype)


@functools.partial(jax.jit, static_argnames=("eps",))
def layernorm(x2d, gamma, beta, eps=LN_EPS):
    R, C = x2d.shape
    tr = R if R <= 512 else (_pick_tile(R, (1024, 512, 256, 128, 64, 32, 16, 8)) or R)
    return pl.pallas_call(
        functools.partial(_layernorm_kernel, eps=eps),
        out_shape=jax.ShapeDtypeStruct((R, C), jnp.bfloat16),
        grid=(R // tr,),
        in_specs=[pl.BlockSpec((tr, C), lambda i: (i, 0)),
                  pl.BlockSpec((1, C), lambda i: (0, 0)),
                  pl.BlockSpec((1, C), lambda i: (0, 0))],
        out_specs=pl.BlockSpec((tr, C), lambda i: (i, 0)),
        compiler_params=pltpu.CompilerParams(dimension_semantics=("parallel",)),
    )(x2d, gamma.reshape(1, C).astype(jnp.float32),
      beta.reshape(1, C).astype(jnp.float32))


# ----------------------------------------------------------------------------
# Depth-max (torch .max(axis=2)[0]) on a (B, D, H*W*C) view: no HBM transpose
# ----------------------------------------------------------------------------

def _depth_max_kernel(x_ref, o_ref):
    o_ref[0] = jnp.max(x_ref[0], axis=0)


@jax.jit
def depth_max(x3):
    B, D, F = x3.shape
    tc = _pick_tile(F, (16384, 8192, 4096, 2048, 1024, 512, 256, 128)) or F
    return pl.pallas_call(
        _depth_max_kernel,
        out_shape=jax.ShapeDtypeStruct((B, F), x3.dtype),
        grid=(B, F // tc),
        in_specs=[pl.BlockSpec((1, D, tc), lambda b, c: (b, 0, c))],
        out_specs=pl.BlockSpec((1, tc), lambda b, c: (b, c)),
        compiler_params=pltpu.CompilerParams(
            dimension_semantics=("parallel", "parallel")),
    )(x3)


# ----------------------------------------------------------------------------
# Depthwise 3x3 conv (pad=1) with fused GELU, NHWC, channel-tiled grid
# ----------------------------------------------------------------------------

_GELU_C = 0.7978845608028654  # sqrt(2/pi)


def _dwconv_gelu_kernel(xp_ref, w_ref, b_ref, o_ref):
    Hp, Wp, C = xp_ref.shape[1], xp_ref.shape[2], xp_ref.shape[3]
    H, W = Hp - 2, Wp - 2
    x = xp_ref[0].astype(jnp.float32)
    acc = jnp.zeros((H, W, C), jnp.float32)
    for i in range(3):
        for j in range(3):
            acc = acc + x[i:i + H, j:j + W, :] * w_ref[i * 3 + j, :][None, None, :]
    acc = acc + b_ref[0, :][None, None, :]
    # TODO(synk): GELU fused here uses the tanh approximation (HF uses exact erf GELU).
    acc = 0.5 * acc * (1.0 + jnp.tanh(_GELU_C * (acc + 0.044715 * acc * acc * acc)))
    o_ref[0] = acc.astype(o_ref.dtype)


@jax.jit
def dwconv3x3_gelu(x_bhwc, w9c, bias_c):
    B, H, W, C = x_bhwc.shape
    xp = jnp.pad(x_bhwc, ((0, 0), (1, 1), (1, 1), (0, 0)))
    tc = C if C <= 512 else (_pick_tile(C, (512, 256, 128)) or C)
    return pl.pallas_call(
        _dwconv_gelu_kernel,
        out_shape=jax.ShapeDtypeStruct((B, H, W, C), jnp.bfloat16),
        grid=(B, C // tc),
        in_specs=[pl.BlockSpec((1, H + 2, W + 2, tc), lambda b, c: (b, 0, 0, c)),
                  pl.BlockSpec((9, tc), lambda b, c: (0, c)),
                  pl.BlockSpec((1, tc), lambda b, c: (0, c))],
        out_specs=pl.BlockSpec((1, H, W, tc), lambda b, c: (b, 0, 0, c)),
        compiler_params=pltpu.CompilerParams(
            dimension_semantics=("parallel", "parallel")),
    )(xp, w9c.astype(jnp.float32), bias_c.reshape(1, C).astype(jnp.float32))


# ----------------------------------------------------------------------------
# im2col glue (pure data movement, channels-last, bf16); matmuls do the compute
# ----------------------------------------------------------------------------

def im2col2d_nhwc(x, kh, kw, stride, pad):
    """x: (B, H, W, C) -> (B*Ho*Wo, kh*kw*C), feature order (kh, kw, C)."""
    B, H, W, C = x.shape
    xp = jnp.pad(x, ((0, 0), (pad, pad), (pad, pad), (0, 0)))
    Ho = (H + 2 * pad - kh) // stride + 1
    Wo = (W + 2 * pad - kw) // stride + 1
    cols = []
    for i in range(kh):
        for j in range(kw):
            cols.append(xp[:, i:i + (Ho - 1) * stride + 1:stride,
                           j:j + (Wo - 1) * stride + 1:stride, :])
    patches = jnp.stack(cols, axis=3).reshape(B * Ho * Wo, kh * kw * C)
    return patches, Ho, Wo


def conv3d_ndhwc(x, w_mat, b):
    """nn.Conv3d(kernel=3, stride=1, padding=1), channels-last (B, D, H, W, C).
    TODO(synk): replace the HBM im2col with a fused halo-DMA shifted-accumulate
    stem kernel to remove the 27x patch blowup entirely."""
    B, D, H, W, Cin = x.shape
    Cout = w_mat.shape[1]
    xp = jnp.pad(x, ((0, 0), (1, 1), (1, 1), (1, 1), (0, 0)))
    cols = [xp[:, kd:kd + D, ki:ki + H, kj:kj + W, :]
            for kd in range(3) for ki in range(3) for kj in range(3)]
    patches = jnp.stack(cols, axis=4).reshape(B * D * H * W, 27 * Cin)
    y = matmul_bias(patches, w_mat, b)
    return y.reshape(B, D, H, W, Cout)


def conv_transpose2d_k4s2p1(x_nhwc, w_ct, b):
    """nn.ConvTranspose2d(1, 1, kernel=4, stride=2, padding=1), NHWC, C=1."""
    B, H, W, _ = x_nhwc.shape
    up = jnp.zeros((B, 2 * H - 1, 2 * W - 1, 1), x_nhwc.dtype).at[:, ::2, ::2, :].set(x_nhwc)
    w_conv = w_ct[0, 0, ::-1, ::-1].reshape(16, 1)       # flipped kernel (in=out=1)
    patches, Ho, Wo = im2col2d_nhwc(up, 4, 4, 1, 2)      # pad = k - 1 - p = 2
    y = matmul_bias(patches, w_conv, b, out_dtype=jnp.float32)
    return y.reshape(B, Ho, Wo, 1)


# ----------------------------------------------------------------------------
# Segformer-B5 (MiT-b5 encoder + all-MLP decode head), inference semantics
# ----------------------------------------------------------------------------

def overlap_patch_embed(x_nhwc, p, patch_size, stride):
    patches, Ho, Wo = im2col2d_nhwc(x_nhwc, patch_size, patch_size, stride,
                                    patch_size // 2)
    # LN fused as matmul epilogue (output block covers the full hidden dim).
    y = matmul_bias(patches, p["proj_w"], p["proj_b"], ln_out=(p["ln_g"], p["ln_b"]))
    return y, Ho, Wo


def efficient_self_attention(tok, ln, B, N, H, W, p, num_heads, sr_ratio):
    """tok: (B*N, C).  If `ln` is given it is fused into q/k/v (sr==1 path);
    otherwise tok is already LayerNormed (sr>1 path)."""
    C = tok.shape[1]
    dh = C // num_heads
    q = matmul_bias(tok, p["q_w"], p["q_b"], ln_in=ln)
    if sr_ratio > 1:
        x_img = tok.reshape(B, H, W, C)
        patches, Ho, Wo = im2col2d_nhwc(x_img, sr_ratio, sr_ratio, sr_ratio, 0)
        kv = matmul_bias(patches, p["sr_w"], p["sr_b"])
        Nk = Ho * Wo
        kv_ln = (p["sr_ln_g"], p["sr_ln_b"])     # fused into k / v projections
    else:
        kv, Nk, kv_ln = tok, N, ln
    k = matmul_bias(kv, p["k_w"], p["k_b"], ln_in=kv_ln)
    v = matmul_bias(kv, p["v_w"], p["v_b"], ln_in=kv_ln)

    qh = q.reshape(B, N, num_heads, dh).transpose(0, 2, 1, 3).reshape(B * num_heads, N, dh)
    kh = k.reshape(B, Nk, num_heads, dh).transpose(0, 2, 1, 3).reshape(B * num_heads, Nk, dh)
    vh = v.reshape(B, Nk, num_heads, dh).transpose(0, 2, 1, 3).reshape(B * num_heads, Nk, dh)
    ctx = fused_attention(qh, kh, vh, scale=1.0 / math.sqrt(dh))
    ctx = ctx.reshape(B, num_heads, N, dh).transpose(0, 2, 1, 3).reshape(B * N, C)
    return matmul_bias(ctx, p["proj_w"], p["proj_b"])    # SegformerSelfOutput.dense


def mix_ffn(x2, ln2, B, H, W, p):
    hidden = p["fc1_w"].shape[1]
    h = matmul_bias(x2, p["fc1_w"], p["fc1_b"], ln_in=ln2)      # ln2 fused
    h = dwconv3x3_gelu(h.reshape(B, H, W, hidden), p["dw_w"], p["dw_b"])
    return matmul_bias(h.reshape(B * H * W, hidden), p["fc2_w"], p["fc2_b"])


def segformer_block(x, H, W, p, num_heads, sr_ratio):
    B, N, C = x.shape
    x2 = x.reshape(B * N, C)
    if sr_ratio > 1:
        # ln1 materialized once (needed both for q and the SR-conv im2col).
        h = layernorm(x2, p["ln1_g"], p["ln1_b"])
        attn = efficient_self_attention(h, None, B, N, H, W,
                                        p["attn"], num_heads, sr_ratio)
    else:
        attn = efficient_self_attention(x2, (p["ln1_g"], p["ln1_b"]), B, N, H, W,
                                        p["attn"], num_heads, sr_ratio)
    x = x + attn.reshape(B, N, C)
    ffn = mix_ffn(x.reshape(B * N, C), (p["ln2_g"], p["ln2_b"]), B, H, W, p["ffn"])
    return x + ffn.reshape(B, N, C)


def segformer_encoder(x_nhwc, params):
    B = x_nhwc.shape[0]
    outs = []
    hs = x_nhwc
    for s in range(4):
        sp = params["stages"][s]
        tokens, Ho, Wo = overlap_patch_embed(hs, sp["patch_embed"],
                                             CFG["patch_sizes"][s], CFG["strides"][s])
        C = CFG["hidden_sizes"][s]
        x = tokens.reshape(B, Ho * Wo, C)
        for blk in sp["blocks"]:
            x = segformer_block(x, Ho, Wo, blk,
                                CFG["num_heads"][s], CFG["sr_ratios"][s])
        tokens = layernorm(x.reshape(B * Ho * Wo, C), sp["ln_g"], sp["ln_b"])
        hs = tokens.reshape(B, Ho, Wo, C)
        outs.append(hs)
    return outs


def decode_head(enc_states, p):
    B, h1, w1, _ = enc_states[0].shape
    dec = CFG["decoder_hidden"]
    ups = []
    for i, hs in enumerate(enc_states):
        _, H, W, C = hs.shape
        proj = matmul_bias(hs.reshape(B * H * W, C), p["mlp_w"][i], p["mlp_b"][i])
        img = proj.reshape(B, H, W, dec)
        # TODO(synk): bilinear upsample (align_corners=False) via jax.image.resize, not Pallas.
        img = jax.image.resize(img, (B, h1, w1, dec), method="bilinear")
        ups.append(img)
    fused_in = jnp.concatenate(ups[::-1], axis=-1)           # (B, h1, w1, 4*768)
    x = fused_in.reshape(B * h1 * w1, 4 * dec)
    # Fold eval-mode BatchNorm2d into the 1x1 fuse conv; fuse ReLU epilogue.
    scale = p["bn_g"] / jnp.sqrt(p["bn_var"] + 1e-5)
    shift = p["bn_b"] - p["bn_mean"] * scale
    x = matmul_bias(x, p["fuse_w"] * scale[None, :], shift, act="relu")
    logits = matmul_bias(x, p["cls_w"], p["cls_b"], out_dtype=jnp.float32)
    return logits.reshape(B, h1, w1, CFG["num_labels"])


def cnn3d_segformer_b5_forward(image, params):
    B, _, D, H, W = image.shape
    # NCDHW (Cin=1) -> NDHWC is a pure reshape (no transpose copy).
    x = image.reshape(B, D, H, W, 1).astype(jnp.bfloat16)
    for n in (1, 2, 3, 4):
        x = conv3d_ndhwc(x, params[f"c3d{n}_w"], params[f"c3d{n}_b"])
    C = x.shape[-1]
    x = depth_max(x.reshape(B, D, H * W * C)).reshape(B, H, W, C)   # max over D
    enc = segformer_encoder(x, params["segformer"])
    logits = decode_head(enc, params["decode_head"])                # (B, H/4, W/4, 1)
    y = conv_transpose2d_k4s2p1(logits, params["up1_w"], params["up1_b"])
    y = conv_transpose2d_k4s2p1(y, params["up2_w"], params["up2_b"])
    # (B, H, W, 1) and (B, 1, H, W) share memory order when C == 1.
    return y.reshape(B, 1, y.shape[1], y.shape[2])


# ----------------------------------------------------------------------------
# Deterministic parameter construction.  Matmul weights are pre-transposed to
# (in, out), pre-cast to bf16 once; conv-as-matmul weights are (k..*Cin, Cout).
# ----------------------------------------------------------------------------

def init_params(seed=0):
    rng = np.random.default_rng(seed)

    def randn(shape, scale, dtype=jnp.bfloat16):
        return jnp.asarray(rng.standard_normal(shape, dtype=np.float32) * scale, dtype=dtype)

    def lin(cin, cout):
        return randn((cin, cout), 0.02)

    def zeros(shape, dtype=jnp.float32):
        return jnp.zeros(shape, dtype)

    def ones(shape, dtype=jnp.float32):
        return jnp.ones(shape, dtype)

    params = {}
    for n, (ci, co) in enumerate([(1, 4), (4, 8), (8, 16), (16, 32)], start=1):
        params[f"c3d{n}_w"] = randn((27 * ci, co), 1.0 / math.sqrt(ci * 27))
        params[f"c3d{n}_b"] = zeros((co,))

    stages = []
    in_ch = CFG["num_channels"]
    for s in range(4):
        C = CFG["hidden_sizes"][s]
        ps = CFG["patch_sizes"][s]
        sr = CFG["sr_ratios"][s]
        hidden = C * CFG["mlp_ratio"]
        patch_embed = dict(
            proj_w=randn((ps * ps * in_ch, C), 1.0 / math.sqrt(in_ch * ps * ps)),
            proj_b=zeros((C,)), ln_g=ones((C,)), ln_b=zeros((C,)))
        blocks = []
        for _ in range(CFG["depths"][s]):
            attn = dict(q_w=lin(C, C), q_b=zeros((C,)),
                        k_w=lin(C, C), k_b=zeros((C,)),
                        v_w=lin(C, C), v_b=zeros((C,)),
                        proj_w=lin(C, C), proj_b=zeros((C,)))
            if sr > 1:
                attn.update(sr_w=randn((sr * sr * C, C), 1.0 / math.sqrt(C * sr * sr)),
                            sr_b=zeros((C,)), sr_ln_g=ones((C,)), sr_ln_b=zeros((C,)))
            ffn = dict(fc1_w=lin(C, hidden), fc1_b=zeros((hidden,)),
                       dw_w=randn((9, hidden), 1.0 / 3.0, dtype=jnp.float32),
                       dw_b=zeros((hidden,)),
                       fc2_w=lin(hidden, C), fc2_b=zeros((C,)))
            blocks.append(dict(ln1_g=ones((C,)), ln1_b=zeros((C,)),
                               ln2_g=ones((C,)), ln2_b=zeros((C,)),
                               attn=attn, ffn=ffn))
        stages.append(dict(patch_embed=patch_embed, blocks=blocks,
                           ln_g=ones((C,)), ln_b=zeros((C,))))
        in_ch = C
    params["segformer"] = dict(stages=stages)

    dec = CFG["decoder_hidden"]
    params["decode_head"] = dict(
        mlp_w=[lin(CFG["hidden_sizes"][i], dec) for i in range(4)],
        mlp_b=[zeros((dec,)) for _ in range(4)],
        fuse_w=randn((4 * dec, dec), 1.0 / math.sqrt(4 * dec)),
        bn_g=ones((dec,)), bn_b=zeros((dec,)),
        bn_mean=zeros((dec,)), bn_var=ones((dec,)),
        cls_w=lin(dec, CFG["num_labels"]), cls_b=zeros((CFG["num_labels"],)))

    for n in (1, 2):
        params[f"up{n}_w"] = randn((1, 1, 4, 4), 0.25, dtype=jnp.float32)
        params[f"up{n}_b"] = zeros((1,))
    return params


if __name__ == "__main__":
    B, D, H, W = 2, 6, 32, 32
    key = jax.random.PRNGKey(0)
    image = jax.random.normal(key, (B, 1, D, H, W), dtype=jnp.float32)

    params = init_params(seed=0)
    out = cnn3d_segformer_b5_forward(image, params)
    out = jax.block_until_ready(out)

    assert out.shape == (B, 1, H, W), out.shape
    assert bool(jnp.all(jnp.isfinite(out)))
    print("KERNEL_OK")
</pallas_src>

<mosaic_0001>
module attributes {stable_mosaic.version = 11 : i64} {
  func.func @_matmul_kernel(%arg0: i32, %arg1: i32, %arg2: memref<512x27xbf16, #tpu.memory_space<vmem>>, %arg3: memref<27x4xbf16, #tpu.memory_space<vmem>>, %arg4: memref<1x4xf32, #tpu.memory_space<vmem>>, %arg5: memref<512x4xbf16, #tpu.memory_space<vmem>>) attributes {dimension_semantics = [#tpu.dimension_semantics<parallel>, #tpu.dimension_semantics<parallel>], iteration_bounds = array<i64: 24, 1>, scalar_prefetch = 0 : i64, scratch_operands = 0 : i64, tpu.core_type = #tpu.core_type<tc>, window_params = [{transform_indices = @transform_0, window_bounds = array<i64: 512, 27>}, {transform_indices = @transform_1, window_bounds = array<i64: 27, 4>}, {transform_indices = @transform_2, window_bounds = array<i64: 1, 4>}, {transform_indices = @transform_3, window_bounds = array<i64: 512, 4>}]} {
    %c0 = arith.constant 0 : index
    %c0_0 = arith.constant 0 : index
    %0 = vector.load %arg2[%c0, %c0_0] : memref<512x27xbf16, #tpu.memory_space<vmem>>, vector<512x27xbf16>
    %c0_1 = arith.constant 0 : index
    %c0_2 = arith.constant 0 : index
    %1 = vector.load %arg3[%c0_1, %c0_2] : memref<27x4xbf16, #tpu.memory_space<vmem>>, vector<27x4xbf16>
    %cst = arith.constant dense<0.000000e+00> : vector<512x4xf32>
    %2 = tpu.matmul %0, %1, %cst {dimension_numbers = #tpu.dot_dimension_numbers<[1], [0], [0], [1], [0, 0, 1, 1], [], []>} : vector<512x27xbf16>, vector<27x4xbf16>, vector<512x4xf32> -> vector<512x4xf32>
    %c0_3 = arith.constant 0 : index
    %c0_4 = arith.constant 0 : index
    %3 = vector.load %arg4[%c0_3, %c0_4] : memref<1x4xf32, #tpu.memory_space<vmem>>, vector<1x4xf32>
    %4 = vector.broadcast %3 : vector<1x4xf32> to vector<512x4xf32>
    %5 = arith.addf %2, %4 : vector<512x4xf32>
    %6 = arith.truncf %5 : vector<512x4xf32> to vector<512x4xbf16>
    %c0_5 = arith.constant 0 : index
    %c0_6 = arith.constant 0 : index
    %7 = vector.load %arg5[%c0_5, %c0_6] : memref<512x4xbf16, #tpu.memory_space<vmem>>, vector<512x4xbf16>
    tpu.vector_store %arg5[%c0_5, %c0_6], %6 {strides = array<i32>} : memref<512x4xbf16, #tpu.memory_space<vmem>>, vector<512x4xbf16>,
    return
  }
  func.func @transform_0(%arg0: i32, %arg1: i32) -> (i32, i32) {
    %c0_i32 = arith.constant 0 : i32
    %c0_i32_0 = arith.constant 0 : i32
    return %arg0, %c0_i32 : i32, i32
  }
  func.func @transform_1(%arg0: i32, %arg1: i32) -> (i32, i32) {
    %c0_i32 = arith.constant 0 : i32
    %c0_i32_0 = arith.constant 0 : i32
    return %c0_i32, %arg1 : i32, i32
  }
  func.func @transform_2(%arg0: i32, %arg1: i32) -> (i32, i32) {
    %c0_i32 = arith.constant 0 : i32
    %c0_i32_0 = arith.constant 0 : i32
    return %c0_i32, %arg1 : i32, i32
  }
  func.func @transform_3(%arg0: i32, %arg1: i32) -> (i32, i32) {
    %c0_i32 = arith.constant 0 : i32
    return %arg0, %arg1 : i32, i32
  }
}

</mosaic_0001>

<bundles_post_ra>
// kernel: matmul_bias.1
= control target key start
LH: loop header
LB: loop body
LE: loop exit
PB: predicated region body
PF: predicated region fallthrough
CT: control target
= control target key end

     0   :  { %s1265_s12 = smov 0   ;;  %s1267_s13 = smov 0   ;;  %s1579_s0 = inlined_call_operand.vmem [shape: bf16[12288,27], index: 0, kind: input, shape index: {}]   ;;  %s1580_s1 = inlined_call_operand.vmem [shape: bf16[27,4], index: 1, kind: input, shape index: {}]   ;;  %s1581_s2 = inlined_call_operand.vmem [shape: f32[1,4], index: 2, kind: input, shape index: {}]   ;;  %s1582_s3 = inlined_call_operand.vmem [shape: bf16[12288,4], index: 3, kind: output, shape index: {}]  }
   0x1   :  { %s1269_s14 = smov 0  }
   0x2 LB: > { %s25_s15 = sadd.s32 1, %s1238_s13  ;;  %p979_p0 = scmp.ge.s32.totalorder %s1242_s14, 1  ;;  %s1242_s14 = sphi %s1269_s14, %s13_s14   ;;  %s1238_s13 = sphi %s1267_s13, %s1584_s13   ;;  %s1234_s12 = sphi %s1265_s12, %s1583_s12  }
   0x3   : > { %p27_p1 = scmp.ge.s32.totalorder %s25_s15, 24  ;;  %p169_p2 = scmp.lt.s32.totalorder %s1242_s14, 25 }
   0x5   : > { %s1586_s15 = smov (%p27_p1, %s25_s15), 0  ;;  %p170_p3 = pnand %p979_p0, %p169_p2 }
   0x6   : > { %s980_s20 = sshll.u32 (!%p170_p3), %s1234_s12, 6 }
   0x7   : > { %173 = sbr.rel (%p170_p3) target bundleno = 284 (0x11c), region = 32  ;;  %p204_p4 = scmp.lt.s32.totalorder (!%p170_p3), %s980_s20, 1535 }
   0xc   : > { %v1118_v0 = vld [vmem:[%s1580_s1 + $0x8] sm:$0xf]  ;;  %v1187_v1 = vld [vmem:[%s1580_s1 + $0x8] sm:$0x30]  ;;  %vm566_vm0 = vcmask 1044480   ;;  %vm567_vm1 = vcmask 1045504  }
   0xd   : > { %v1119_v2 = vor.u32 %v1187_v1, %v1118_v0  ;;  %v1244_v3 = vmov 65535   ;;  %s1588_s20 = smov (!%p204_p4, %s980_s20), 1535  ;;  %v1186_v7 = vld [vmem:[%s1580_s1] sm:$0xff]  ;;  %vm469_vm2 = vcmask 220160   ;;  %vm806_vm3 = vcmask 27648  }
   0xe   : > { %v568_v4 = vsel %vm566_vm0, 4294967295, %v1244_v3  ;;  %s981_s23 = sshll.u32 %s1588_s20, 2  ;;  %v1369_v40 = vld [vmem:[%s1581_s2] ss:$0 sm:$0xff] }
   0xf   : > { %v569_v5 = vsel %vm567_vm1, %v568_v4, 0  ;;  %s1300_s26 = scalar_lea.vmem %s1579_s0, %s981_s23  ;;  %s1378_s4 = scalar_lea.vmem %s1582_s3, %s981_s23 }
  0x10   : > { %v571_v6 = vand.u32 %v1119_v2, %v569_v5  ;;  %v1154_v8 = vld [vmem:[%s1300_s26] sm:$0xff]  ;;  %v1155_v12 = vld [vmem:[%s1300_s26 + $0x8] sm:$0xff]  ;;  %v1156_v16 = vld [vmem:[%s1300_s26 + $0x10] sm:$0xff] }
  0x11   : > { %v1162_v9 = vld [vmem:[%s1300_s26 + $0x40] sm:$0xff]  ;;  %v1163_v13 = vld [vmem:[%s1300_s26 + $0x48] sm:$0xff]  ;;  %v1164_v17 = vld [vmem:[%s1300_s26 + $0x50] sm:$0xff] }
  0x12   : > { %579 = vmatpush.bf16.msra.mxu0 %v571_v6  ;;  %1188 = vmatpush.bf16.msra.mxu1 %v571_v6  ;;  %v1170_v10 = vld [vmem:[%s1300_s26 + $0x80] sm:$0xff]  ;;  %v1171_v14 = vld [vmem:[%s1300_s26 + $0x88] sm:$0xff]  ;;  %v1172_v18 = vld [vmem:[%s1300_s26 + $0x90] sm:$0xff] }
  0x13   : > { %1189 = vmatpush.bf16.msra.mxu2 %v571_v6  ;;  %1190 = vmatpush.bf16.msra.mxu3 %v571_v6  ;;  %v1178_v11 = vld [vmem:[%s1300_s26 + $0xc0] sm:$0xff]  ;;  %v1179_v15 = vld [vmem:[%s1300_s26 + $0xc8] sm:$0xff]  ;;  %v1180_v19 = vld [vmem:[%s1300_s26 + $0xd0] sm:$0xff] }
  0x14   : > { %v1157_v20 = vld [vmem:[%s1300_s26 + $0x18] sm:$0xff]  ;;  %v1158_v24 = vld [vmem:[%s1300_s26 + $0x20] sm:$0xff]  ;;  %v1159_v28 = vld [vmem:[%s1300_s26 + $0x28] sm:$0xff] }
  0x15   : > { %v1165_v21 = vld [vmem:[%s1300_s26 + $0x58] sm:$0xff]  ;;  %v1166_v25 = vld [vmem:[%s1300_s26 + $0x60] sm:$0xff]  ;;  %v1167_v29 = vld [vmem:[%s1300_s26 + $0x68] sm:$0xff] }
  0x16   : > { %580 = vmatpush.bf16.msra.mxu0 %v1186_v7  ;;  %1191 = vmatpush.bf16.msra.mxu1 %v1186_v7  ;;  %v1173_v22 = vld [vmem:[%s1300_s26 + $0x98] sm:$0xff]  ;;  %v1174_v26 = vld [vmem:[%s1300_s26 + $0xa0] sm:$0xff]  ;;  %v1175_v30 = vld [vmem:[%s1300_s26 + $0xa8] sm:$0xff] }
  0x17   : > { %1192 = vmatpush.bf16.msra.mxu2 %v1186_v7  ;;  %1193 = vmatpush.bf16.msra.mxu3 %v1186_v7  ;;  %v1181_v23 = vld [vmem:[%s1300_s26 + $0xd8] sm:$0xff]  ;;  %v1182_v27 = vld [vmem:[%s1300_s26 + $0xe0] sm:$0xff]  ;;  %v1183_v31 = vld [vmem:[%s1300_s26 + $0xe8] sm:$0xff] }
  0x18   : > { %v1160_v32 = vld [vmem:[%s1300_s26 + $0x30] sm:$0xff]  ;;  %v1161_v36 = vld [vmem:[%s1300_s26 + $0x38] sm:$0xff] }
  0x19   : > { %1120 = vmatmul.msk.bf16.vlgmr.msra.gmra.mxu0 %vm469_vm2, %v1154_v8  ;;  %1128 = vmatmul.msk.bf16.vlgmr.msra.gmra.mxu1 %vm469_vm2, %v1162_v9  ;;  %v1168_v33 = vld [vmem:[%s1300_s26 + $0x70] sm:$0xff]  ;;  %v1169_v37 = vld [vmem:[%s1300_s26 + $0x78] sm:$0xff] }
  0x1a   : > { %1136 = vmatmul.msk.bf16.vlgmr.msra.gmra.mxu2 %vm469_vm2, %v1170_v10  ;;  %1144 = vmatmul.msk.bf16.vlgmr.msra.gmra.mxu3 %vm469_vm2, %v1178_v11  ;;  %v1176_v34 = vld [vmem:[%s1300_s26 + $0xb0] sm:$0xff]  ;;  %v1177_v38 = vld [vmem:[%s1300_s26 + $0xb8] sm:$0xff] }
  0x1b   : > { %v1184_v35 = vld [vmem:[%s1300_s26 + $0xf0] sm:$0xff]  ;;  %v1185_v39 = vld [vmem:[%s1300_s26 + $0xf8] sm:$0xff] }
  0x29   : > { %1121 = vmatmul.msk.bf16.gmra.mxu0 %vm469_vm2, %v1155_v12  ;;  %1129 = vmatmul.msk.bf16.gmra.mxu1 %vm469_vm2, %v1163_v13 }
  0x2a   : > { %1137 = vmatmul.msk.bf16.gmra.mxu2 %vm469_vm2, %v1171_v14  ;;  %1145 = vmatmul.msk.bf16.gmra.mxu3 %vm469_vm2, %v1179_v15 }
  0x39   : > { %1122 = vmatmul.msk.bf16.gmra.mxu0 %vm469_vm2, %v1156_v16  ;;  %1130 = vmatmul.msk.bf16.gmra.mxu1 %vm469_vm2, %v1164_v17 }
  0x3a   : > { %1138 = vmatmul.msk.bf16.gmra.mxu2 %vm469_vm2, %v1172_v18  ;;  %1146 = vmatmul.msk.bf16.gmra.mxu3 %vm469_vm2, %v1180_v19 }
  0x49   : > { %1123 = vmatmul.msk.bf16.gmra.mxu0 %vm469_vm2, %v1157_v20  ;;  %1131 = vmatmul.msk.bf16.gmra.mxu1 %vm469_vm2, %v1165_v21 }
  0x4a   : > { %1139 = vmatmul.msk.bf16.gmra.mxu2 %vm469_vm2, %v1173_v22  ;;  %1147 = vmatmul.msk.bf16.gmra.mxu3 %vm469_vm2, %v1181_v23 }
  0x59   : > { %1124 = vmatmul.msk.bf16.gmra.mxu0 %vm469_vm2, %v1158_v24  ;;  %1132 = vmatmul.msk.bf16.gmra.mxu1 %vm469_vm2, %v1166_v25 }
  0x5a   : > { %1140 = vmatmul.msk.bf16.gmra.mxu2 %vm469_vm2, %v1174_v26  ;;  %1148 = vmatmul.msk.bf16.gmra.mxu3 %vm469_vm2, %v1182_v27 }
  0x69   : > { %1125 = vmatmul.msk.bf16.gmra.mxu0 %vm469_vm2, %v1159_v28  ;;  %1133 = vmatmul.msk.bf16.gmra.mxu1 %vm469_vm2, %v1167_v29 }
  0x6a   : > { %1141 = vmatmul.msk.bf16.gmra.mxu2 %vm469_vm2, %v1175_v30  ;;  %1149 = vmatmul.msk.bf16.gmra.mxu3 %vm469_vm2, %v1183_v31 }
  0x79   : > { %1126 = vmatmul.msk.bf16.gmra.mxu0 %vm469_vm2, %v1160_v32  ;;  %1134 = vmatmul.msk.bf16.gmra.mxu1 %vm469_vm2, %v1168_v33 }
  0x7a   : > { %1142 = vmatmul.msk.bf16.gmra.mxu2 %vm469_vm2, %v1176_v34  ;;  %1150 = vmatmul.msk.bf16.gmra.mxu3 %vm469_vm2, %v1184_v35 }
  0x89   : > { %1127 = vmatmul.msk.bf16.gmra.mxu0 %vm469_vm2, %v1161_v36  ;;  %1135 = vmatmul.msk.bf16.gmra.mxu1 %vm469_vm2, %v1169_v37 }
  0x8a   : > { %1143 = vmatmul.msk.bf16.gmra.mxu2 %vm469_vm2, %v1177_v38  ;;  %1151 = vmatmul.msk.bf16.gmra.mxu3 %vm469_vm2, %v1185_v39 }
  0x96   : > { %v582_v41 = vpop.f32.mrf.mxu0  ;;  %v622_v42 = vpop.f32.mrf.mxu1 }
  0x97   : > { %v583_v43 = vadd.f32 %v1369_v40, %v582_v41  ;;  %v623_v44 = vadd.f32 %v1369_v40, %v622_v42 }
  0x99   : > { %v742_v45 = vpack.c.bf16 %v583_v43, %v583_v43  ;;  %v758_v46 = vpack.c.bf16 %v623_v44, %v623_v44 }
  0x9b   : > { %807 = vst.msk [vmem:[%s1378_s4] sm:$0xf] %vm806_vm3, %v742_v45 }
  0x9c   : > { %823 = vst.msk [vmem:[%s1378_s4 + $0x40] sm:$0xf] %vm806_vm3, %v758_v46 }
  0x9d   : > { %v662_v47 = vpop.f32.mrf.mxu2  ;;  %v702_v48 = vpop.f32.mrf.mxu3 }
  0x9e   : > { %v663_v49 = vadd.f32 %v1369_v40, %v662_v47  ;;  %v703_v50 = vadd.f32 %v1369_v40, %v702_v48  ;;  %v584_v51 = vpop.f32.mrf.mxu0  ;;  %v624_v52 = vpop.f32.mrf.mxu1 }
  0x9f   : > { %v585_v53 = vadd.f32 %v1369_v40, %v584_v51  ;;  %v625_v54 = vadd.f32 %v1369_v40, %v624_v52 }
  0xa0   : > { %v774_v55 = vpack.c.bf16 %v663_v49, %v663_v49  ;;  %v790_v56 = vpack.c.bf16 %v703_v50, %v703_v50 }
  0xa1   : > { %v743_v57 = vpack.c.bf16 %v585_v53, %v585_v53  ;;  %v759_v58 = vpack.c.bf16 %v625_v54, %v625_v54 }
  0xa2   : > { %839 = vst.msk [vmem:[%s1378_s4 + $0x80] sm:$0xf] %vm806_vm3, %v774_v55 }
  0xa3   : > { %855 = vst.msk [vmem:[%s1378_s4 + $0xc0] sm:$0xf] %vm806_vm3, %v790_v56 }
  0xa4   : > { %808 = vst.msk [vmem:[%s1378_s4 + $0x4] sm:$0xf] %vm806_vm3, %v743_v57 }
  0xa5   : > { %824 = vst.msk [vmem:[%s1378_s4 + $0x44] sm:$0xf] %vm806_vm3, %v759_v58  ;;  %v664_v59 = vpop.f32.mrf.mxu2  ;;  %v704_v60 = vpop.f32.mrf.mxu3 }
  0xa6   : > { %v665_v61 = vadd.f32 %v1369_v40, %v664_v59  ;;  %v705_v62 = vadd.f32 %v1369_v40, %v704_v60  ;;  %v587_v63 = vpop.f32.mrf.mxu0  ;;  %v627_v0 = vpop.f32.mrf.mxu1 }
  0xa7   : > { %v588_v1 = vadd.f32 %v1369_v40, %v587_v63  ;;  %v628_v2 = vadd.f32 %v1369_v40, %v627_v0 }
  0xa8   : > { %v775_v3 = vpack.c.bf16 %v665_v61, %v665_v61  ;;  %v791_v4 = vpack.c.bf16 %v705_v62, %v705_v62 }
  0xa9   : > { %v744_v5 = vpack.c.bf16 %v588_v1, %v588_v1  ;;  %v760_v6 = vpack.c.bf16 %v628_v2, %v628_v2 }
  0xaa   : > { %840 = vst.msk [vmem:[%s1378_s4 + $0x84] sm:$0xf] %vm806_vm3, %v775_v3 }
  0xab   : > { %856 = vst.msk [vmem:[%s1378_s4 + $0xc4] sm:$0xf] %vm806_vm3, %v791_v4 }
  0xac   : > { %809 = vst.msk [vmem:[%s1378_s4 + $0x8] sm:$0xf] %vm806_vm3, %v744_v5 }
  0xad   : > { %825 = vst.msk [vmem:[%s1378_s4 + $0x48] sm:$0xf] %vm806_vm3, %v760_v6  ;;  %v667_v7 = vpop.f32.mrf.mxu2  ;;  %v707_v8 = vpop.f32.mrf.mxu3 }
  0xae   : > { %v668_v9 = vadd.f32 %v1369_v40, %v667_v7  ;;  %v708_v10 = vadd.f32 %v1369_v40, %v707_v8  ;;  %v589_v11 = vpop.f32.mrf.mxu0  ;;  %v629_v12 = vpop.f32.mrf.mxu1 }
  0xaf   : > { %v590_v13 = vadd.f32 %v1369_v40, %v589_v11  ;;  %v630_v14 = vadd.f32 %v1369_v40, %v629_v12 }
  0xb0   : > { %v776_v15 = vpack.c.bf16 %v668_v9, %v668_v9  ;;  %v792_v16 = vpack.c.bf16 %v708_v10, %v708_v10 }
  0xb1   : > { %v745_v17 = vpack.c.bf16 %v590_v13, %v590_v13  ;;  %v761_v18 = vpack.c.bf16 %v630_v14, %v630_v14 }
  0xb2   : > { %841 = vst.msk [vmem:[%s1378_s4 + $0x88] sm:$0xf] %vm806_vm3, %v776_v15 }
  0xb3   : > { %857 = vst.msk [vmem:[%s1378_s4 + $0xc8] sm:$0xf] %vm806_vm3, %v792_v16 }
  0xb4   : > { %810 = vst.msk [vmem:[%s1378_s4 + $0xc] sm:$0xf] %vm806_vm3, %v745_v17 }
  0xb5   : > { %826 = vst.msk [vmem:[%s1378_s4 + $0x4c] sm:$0xf] %vm806_vm3, %v761_v18  ;;  %v669_v19 = vpop.f32.mrf.mxu2  ;;  %v709_v20 = vpop.f32.mrf.mxu3 }
  0xb6   : > { %v670_v21 = vadd.f32 %v1369_v40, %v669_v19  ;;  %v710_v22 = vadd.f32 %v1369_v40, %v709_v20  ;;  %v592_v23 = vpop.f32.mrf.mxu0  ;;  %v632_v24 = vpop.f32.mrf.mxu1 }
  0xb7   : > { %v593_v25 = vadd.f32 %v1369_v40, %v592_v23  ;;  %v633_v26 = vadd.f32 %v1369_v40, %v632_v24 }
  0xb8   : > { %v777_v27 = vpack.c.bf16 %v670_v21, %v670_v21  ;;  %v793_v28 = vpack.c.bf16 %v710_v22, %v710_v22 }
  0xb9   : > { %v746_v29 = vpack.c.bf16 %v593_v25, %v593_v25  ;;  %v762_v30 = vpack.c.bf16 %v633_v26, %v633_v26 }
  0xba   : > { %842 = vst.msk [vmem:[%s1378_s4 + $0x8c] sm:$0xf] %vm806_vm3, %v777_v27 }
  0xbb   : > { %858 = vst.msk [vmem:[%s1378_s4 + $0xcc] sm:$0xf] %vm806_vm3, %v793_v28 }
  0xbc   : > { %811 = vst.msk [vmem:[%s1378_s4 + $0x10] sm:$0xf] %vm806_vm3, %v746_v29 }
  0xbd   : > { %827 = vst.msk [vmem:[%s1378_s4 + $0x50] sm:$0xf] %vm806_vm3, %v762_v30  ;;  %v672_v31 = vpop.f32.mrf.mxu2  ;;  %v712_v32 = vpop.f32.mrf.mxu3 }
  0xbe   : > { %v673_v33 = vadd.f32 %v1369_v40, %v672_v31  ;;  %v713_v34 = vadd.f32 %v1369_v40, %v712_v32  ;;  %v594_v35 = vpop.f32.mrf.mxu0  ;;  %v634_v36 = vpop.f32.mrf.mxu1 }
  0xbf   : > { %v595_v37 = vadd.f32 %v1369_v40, %v594_v35  ;;  %v635_v38 = vadd.f32 %v1369_v40, %v634_v36 }
  0xc0   : > { %v778_v39 = vpack.c.bf16 %v673_v33, %v673_v33  ;;  %v794_v41 = vpack.c.bf16 %v713_v34, %v713_v34 }
  0xc1   : > { %v747_v42 = vpack.c.bf16 %v595_v37, %v595_v37  ;;  %v763_v43 = vpack.c.bf16 %v635_v38, %v635_v38 }
  0xc2   : > { %843 = vst.msk [vmem:[%s1378_s4 + $0x90] sm:$0xf] %vm806_vm3, %v778_v39 }
  0xc3   : > { %859 = vst.msk [vmem:[%s1378_s4 + $0xd0] sm:$0xf] %vm806_vm3, %v794_v41 }
  0xc4   : > { %812 = vst.msk [vmem:[%s1378_s4 + $0x14] sm:$0xf] %vm806_vm3, %v747_v42 }
  0xc5   : > { %828 = vst.msk [vmem:[%s1378_s4 + $0x54] sm:$0xf] %vm806_vm3, %v763_v43  ;;  %v674_v44 = vpop.f32.mrf.mxu2  ;;  %v714_v45 = vpop.f32.mrf.mxu3 }
  0xc6   : > { %v675_v46 = vadd.f32 %v1369_v40, %v674_v44  ;;  %v715_v47 = vadd.f32 %v1369_v40, %v714_v45  ;;  %v597_v48 = vpop.f32.mrf.mxu0  ;;  %v637_v49 = vpop.f32.mrf.mxu1 }
  0xc7   : > { %v598_v50 = vadd.f32 %v1369_v40, %v597_v48  ;;  %v638_v51 = vadd.f32 %v1369_v40, %v637_v49 }
  0xc8   : > { %v779_v52 = vpack.c.bf16 %v675_v46, %v675_v46  ;;  %v795_v53 = vpack.c.bf16 %v715_v47, %v715_v47 }
  0xc9   : > { %v748_v54 = vpack.c.bf16 %v598_v50, %v598_v50  ;;  %v764_v55 = vpack.c.bf16 %v638_v51, %v638_v51 }
  0xca   : > { %844 = vst.msk [vmem:[%s1378_s4 + $0x94] sm:$0xf] %vm806_vm3, %v779_v52 }
  0xcb   : > { %860 = vst.msk [vmem:[%s1378_s4 + $0xd4] sm:$0xf] %vm806_vm3, %v795_v53 }
  0xcc   : > { %813 = vst.msk [vmem:[%s1378_s4 + $0x18] sm:$0xf] %vm806_vm3, %v748_v54 }
  0xcd   : > { %829 = vst.msk [vmem:[%s1378_s4 + $0x58] sm:$0xf] %vm806_vm3, %v764_v55  ;;  %v677_v56 = vpop.f32.mrf.mxu2  ;;  %v717_v57 = vpop.f32.mrf.mxu3 }
  0xce   : > { %v678_v58 = vadd.f32 %v1369_v40, %v677_v56  ;;  %v718_v59 = vadd.f32 %v1369_v40, %v717_v57  ;;  %v599_v60 = vpop.f32.mrf.mxu0  ;;  %v639_v61 = vpop.f32.mrf.mxu1 }
  0xcf   : > { %v600_v62 = vadd.f32 %v1369_v40, %v599_v60  ;;  %v640_v63 = vadd.f32 %v1369_v40, %v639_v61 }
  0xd0   : > { %v780_v0 = vpack.c.bf16 %v678_v58, %v678_v58  ;;  %v796_v1 = vpack.c.bf16 %v718_v59, %v718_v59 }
  0xd1   : > { %v749_v2 = vpack.c.bf16 %v600_v62, %v600_v62  ;;  %v765_v3 = vpack.c.bf16 %v640_v63, %v640_v63 }
  0xd2   : > { %845 = vst.msk [vmem:[%s1378_s4 + $0x98] sm:$0xf] %vm806_vm3, %v780_v0 }
  0xd3   : > { %861 = vst.msk [vmem:[%s1378_s4 + $0xd8] sm:$0xf] %vm806_vm3, %v796_v1 }
  0xd4   : > { %814 = vst.msk [vmem:[%s1378_s4 + $0x1c] sm:$0xf] %vm806_vm3, %v749_v2 }
  0xd5   : > { %830 = vst.msk [vmem:[%s1378_s4 + $0x5c] sm:$0xf] %vm806_vm3, %v765_v3  ;;  %v679_v4 = vpop.f32.mrf.mxu2  ;;  %v719_v5 = vpop.f32.mrf.mxu3 }
  0xd6   : > { %v680_v6 = vadd.f32 %v1369_v40, %v679_v4  ;;  %v720_v7 = vadd.f32 %v1369_v40, %v719_v5  ;;  %v602_v8 = vpop.f32.mrf.mxu0  ;;  %v642_v9 = vpop.f32.mrf.mxu1 }
  0xd7   : > { %v603_v10 = vadd.f32 %v1369_v40, %v602_v8  ;;  %v643_v11 = vadd.f32 %v1369_v40, %v642_v9 }
  0xd8   : > { %v781_v12 = vpack.c.bf16 %v680_v6, %v680_v6  ;;  %v797_v13 = vpack.c.bf16 %v720_v7, %v720_v7 }
  0xd9   : > { %v750_v14 = vpack.c.bf16 %v603_v10, %v603_v10  ;;  %v766_v15 = vpack.c.bf16 %v643_v11, %v643_v11 }
  0xda   : > { %846 = vst.msk [vmem:[%s1378_s4 + $0x9c] sm:$0xf] %vm806_vm3, %v781_v12 }
  0xdb   : > { %862 = vst.msk [vmem:[%s1378_s4 + $0xdc] sm:$0xf] %vm806_vm3, %v797_v13 }
  0xdc   : > { %815 = vst.msk [vmem:[%s1378_s4 + $0x20] sm:$0xf] %vm806_vm3, %v750_v14 }
  0xdd   : > { %831 = vst.msk [vmem:[%s1378_s4 + $0x60] sm:$0xf] %vm806_vm3, %v766_v15  ;;  %v682_v16 = vpop.f32.mrf.mxu2  ;;  %v722_v17 = vpop.f32.mrf.mxu3 }
  0xde   : > { %v683_v18 = vadd.f32 %v1369_v40, %v682_v16  ;;  %v723_v19 = vadd.f32 %v1369_v40, %v722_v17  ;;  %v604_v20 = vpop.f32.mrf.mxu0  ;;  %v644_v21 = vpop.f32.mrf.mxu1 }
  0xdf   : > { %v605_v22 = vadd.f32 %v1369_v40, %v604_v20  ;;  %v645_v23 = vadd.f32 %v1369_v40, %v644_v21 }
  0xe0   : > { %v782_v24 = vpack.c.bf16 %v683_v18, %v683_v18  ;;  %v798_v25 = vpack.c.bf16 %v723_v19, %v723_v19 }
  0xe1   : > { %v751_v26 = vpack.c.bf16 %v605_v22, %v605_v22  ;;  %v767_v27 = vpack.c.bf16 %v645_v23, %v645_v23 }
  0xe2   : > { %847 = vst.msk [vmem:[%s1378_s4 + $0xa0] sm:$0xf] %vm806_vm3, %v782_v24 }
  0xe3   : > { %863 = vst.msk [vmem:[%s1378_s4 + $0xe0] sm:$0xf] %vm806_vm3, %v798_v25 }
  0xe4   : > { %816 = vst.msk [vmem:[%s1378_s4 + $0x24] sm:$0xf] %vm806_vm3, %v751_v26 }
  0xe5   : > { %832 = vst.msk [vmem:[%s1378_s4 + $0x64] sm:$0xf] %vm806_vm3, %v767_v27  ;;  %v684_v28 = vpop.f32.mrf.mxu2  ;;  %v724_v29 = vpop.f32.mrf.mxu3 }
  0xe6   : > { %v685_v30 = vadd.f32 %v1369_v40, %v684_v28  ;;  %v725_v31 = vadd.f32 %v1369_v40, %v724_v29  ;;  %v607_v32 = vpop.f32.mrf.mxu0  ;;  %v647_v33 = vpop.f32.mrf.mxu1 }
  0xe7   : > { %v608_v34 = vadd.f32 %v1369_v40, %v607_v32  ;;  %v648_v35 = vadd.f32 %v1369_v40, %v647_v33 }
  0xe8   : > { %v783_v36 = vpack.c.bf16 %v685_v30, %v685_v30  ;;  %v799_v37 = vpack.c.bf16 %v725_v31, %v725_v31 }
  0xe9   : > { %v752_v38 = vpack.c.bf16 %v608_v34, %v608_v34  ;;  %v768_v39 = vpack.c.bf16 %v648_v35, %v648_v35 }
  0xea   : > { %848 = vst.msk [vmem:[%s1378_s4 + $0xa4] sm:$0xf] %vm806_vm3, %v783_v36 }
  0xeb   : > { %864 = vst.msk [vmem:[%s1378_s4 + $0xe4] sm:$0xf] %vm806_vm3, %v799_v37 }
  0xec   : > { %817 = vst.msk [vmem:[%s1378_s4 + $0x28] sm:$0xf] %vm806_vm3, %v752_v38 }
  0xed   : > { %833 = vst.msk [vmem:[%s1378_s4 + $0x68] sm:$0xf] %vm806_vm3, %v768_v39  ;;  %v687_v41 = vpop.f32.mrf.mxu2  ;;  %v727_v42 = vpop.f32.mrf.mxu3 }
  0xee   : > { %v688_v43 = vadd.f32 %v1369_v40, %v687_v41  ;;  %v728_v44 = vadd.f32 %v1369_v40, %v727_v42  ;;  %v609_v45 = vpop.f32.mrf.mxu0  ;;  %v649_v46 = vpop.f32.mrf.mxu1 }
  0xef   : > { %v610_v47 = vadd.f32 %v1369_v40, %v609_v45  ;;  %v650_v48 = vadd.f32 %v1369_v40, %v649_v46 }
  0xf0   : > { %v784_v49 = vpack.c.bf16 %v688_v43, %v688_v43  ;;  %v800_v50 = vpack.c.bf16 %v728_v44, %v728_v44 }
  0xf1   : > { %v753_v51 = vpack.c.bf16 %v610_v47, %v610_v47  ;;  %v769_v52 = vpack.c.bf16 %v650_v48, %v650_v48 }
  0xf2   : > { %849 = vst.msk [vmem:[%s1378_s4 + $0xa8] sm:$0xf] %vm806_vm3, %v784_v49 }
  0xf3   : > { %865 = vst.msk [vmem:[%s1378_s4 + $0xe8] sm:$0xf] %vm806_vm3, %v800_v50 }
  0xf4   : > { %818 = vst.msk [vmem:[%s1378_s4 + $0x2c] sm:$0xf] %vm806_vm3, %v753_v51 }
  0xf5   : > { %834 = vst.msk [vmem:[%s1378_s4 + $0x6c] sm:$0xf] %vm806_vm3, %v769_v52  ;;  %v689_v53 = vpop.f32.mrf.mxu2  ;;  %v729_v54 = vpop.f32.mrf.mxu3 }
  0xf6   : > { %v690_v55 = vadd.f32 %v1369_v40, %v689_v53  ;;  %v730_v56 = vadd.f32 %v1369_v40, %v729_v54  ;;  %v612_v57 = vpop.f32.mrf.mxu0  ;;  %v652_v58 = vpop.f32.mrf.mxu1 }
  0xf7   : > { %v613_v59 = vadd.f32 %v1369_v40, %v612_v57  ;;  %v653_v60 = vadd.f32 %v1369_v40, %v652_v58 }
  0xf8   : > { %v785_v61 = vpack.c.bf16 %v690_v55, %v690_v55  ;;  %v801_v62 = vpack.c.bf16 %v730_v56, %v730_v56 }
  0xf9   : > { %v754_v63 = vpack.c.bf16 %v613_v59, %v613_v59  ;;  %v770_v0 = vpack.c.bf16 %v653_v60, %v653_v60 }
  0xfa   : > { %850 = vst.msk [vmem:[%s1378_s4 + $0xac] sm:$0xf] %vm806_vm3, %v785_v61 }
  0xfb   : > { %866 = vst.msk [vmem:[%s1378_s4 + $0xec] sm:$0xf] %vm806_vm3, %v801_v62 }
  0xfc   : > { %819 = vst.msk [vmem:[%s1378_s4 + $0x30] sm:$0xf] %vm806_vm3, %v754_v63 }
  0xfd   : > { %835 = vst.msk [vmem:[%s1378_s4 + $0x70] sm:$0xf] %vm806_vm3, %v770_v0  ;;  %v692_v1 = vpop.f32.mrf.mxu2  ;;  %v732_v2 = vpop.f32.mrf.mxu3 }
  0xfe   : > { %v693_v3 = vadd.f32 %v1369_v40, %v692_v1  ;;  %v733_v4 = vadd.f32 %v1369_v40, %v732_v2  ;;  %v614_v5 = vpop.f32.mrf.mxu0  ;;  %v654_v6 = vpop.f32.mrf.mxu1 }
  0xff   : > { %v615_v7 = vadd.f32 %v1369_v40, %v614_v5  ;;  %v655_v8 = vadd.f32 %v1369_v40, %v654_v6 }
 0x100   : > { %v786_v9 = vpack.c.bf16 %v693_v3, %v693_v3  ;;  %v802_v10 = vpack.c.bf16 %v733_v4, %v733_v4 }
 0x101   : > { %v755_v11 = vpack.c.bf16 %v615_v7, %v615_v7  ;;  %v771_v12 = vpack.c.bf16 %v655_v8, %v655_v8 }
 0x102   : > { %851 = vst.msk [vmem:[%s1378_s4 + $0xb0] sm:$0xf] %vm806_vm3, %v786_v9 }
 0x103   : > { %867 = vst.msk [vmem:[%s1378_s4 + $0xf0] sm:$0xf] %vm806_vm3, %v802_v10 }
 0x104   : > { %820 = vst.msk [vmem:[%s1378_s4 + $0x34] sm:$0xf] %vm806_vm3, %v755_v11 }
 0x105   : > { %836 = vst.msk [vmem:[%s1378_s4 + $0x74] sm:$0xf] %vm806_vm3, %v771_v12  ;;  %v694_v13 = vpop.f32.mrf.mxu2  ;;  %v734_v14 = vpop.f32.mrf.mxu3 }
 0x106   : > { %v695_v15 = vadd.f32 %v1369_v40, %v694_v13  ;;  %v735_v16 = vadd.f32 %v1369_v40, %v734_v14  ;;  %v617_v17 = vpop.f32.mrf.mxu0  ;;  %v657_v18 = vpop.f32.mrf.mxu1 }
 0x107   : > { %v618_v19 = vadd.f32 %v1369_v40, %v617_v17  ;;  %v658_v20 = vadd.f32 %v1369_v40, %v657_v18 }
 0x108   : > { %v787_v21 = vpack.c.bf16 %v695_v15, %v695_v15  ;;  %v803_v22 = vpack.c.bf16 %v735_v16, %v735_v16 }
 0x109   : > { %v756_v23 = vpack.c.bf16 %v618_v19, %v618_v19  ;;  %v772_v24 = vpack.c.bf16 %v658_v20, %v658_v20 }
 0x10a   : > { %852 = vst.msk [vmem:[%s1378_s4 + $0xb4] sm:$0xf] %vm806_vm3, %v787_v21 }
 0x10b   : > { %868 = vst.msk [vmem:[%s1378_s4 + $0xf4] sm:$0xf] %vm806_vm3, %v803_v22 }
 0x10c   : > { %821 = vst.msk [vmem:[%s1378_s4 + $0x38] sm:$0xf] %vm806_vm3, %v756_v23 }
 0x10d   : > { %837 = vst.msk [vmem:[%s1378_s4 + $0x78] sm:$0xf] %vm806_vm3, %v772_v24  ;;  %v697_v25 = vpop.f32.mrf.mxu2  ;;  %v737_v26 = vpop.f32.mrf.mxu3 }
 0x10e   : > { %v698_v27 = vadd.f32 %v1369_v40, %v697_v25  ;;  %v738_v28 = vadd.f32 %v1369_v40, %v737_v26  ;;  %v619_v29 = vpop.f32.mrf.mxu0  ;;  %v659_v30 = vpop.f32.mrf.mxu1 }
 0x10f   : > { %v620_v31 = vadd.f32 %v1369_v40, %v619_v29  ;;  %v660_v32 = vadd.f32 %v1369_v40, %v659_v30 }
 0x110   : > { %v788_v33 = vpack.c.bf16 %v698_v27, %v698_v27  ;;  %v804_v34 = vpack.c.bf16 %v738_v28, %v738_v28 }
 0x111   : > { %v757_v35 = vpack.c.bf16 %v620_v31, %v620_v31  ;;  %v773_v36 = vpack.c.bf16 %v660_v32, %v660_v32 }
 0x112   : > { %853 = vst.msk [vmem:[%s1378_s4 + $0xb8] sm:$0xf] %vm806_vm3, %v788_v33 }
 0x113   : > { %869 = vst.msk [vmem:[%s1378_s4 + $0xf8] sm:$0xf] %vm806_vm3, %v804_v34 }
 0x114   : > { %822 = vst.msk [vmem:[%s1378_s4 + $0x3c] sm:$0xf] %vm806_vm3, %v757_v35 }
 0x115   : > { %838 = vst.msk [vmem:[%s1378_s4 + $0x7c] sm:$0xf] %vm806_vm3, %v773_v36  ;;  %v699_v37 = vpop.f32.mrf.mxu2  ;;  %v739_v38 = vpop.f32.mrf.mxu3 }
 0x116   : > { %v700_v39 = vadd.f32 %v1369_v40, %v699_v37  ;;  %v740_v41 = vadd.f32 %v1369_v40, %v739_v38 }
 0x118   : > { %v789_v42 = vpack.c.bf16 %v700_v39, %v700_v39  ;;  %v805_v43 = vpack.c.bf16 %v740_v41, %v740_v41 }
 0x11a   : > { %854 = vst.msk [vmem:[%s1378_s4 + $0xbc] sm:$0xf] %vm806_vm3, %v789_v42 }
 0x11b   : > { %870 = vst.msk [vmem:[%s1378_s4 + $0xfc] sm:$0xf] %vm806_vm3, %v805_v43 }
 0x11c PF: > { %s13_s14 = sadd.s32 1, %s1242_s14   ;;  %s1583_s12 = smov %s1238_s13 }
 0x11d   : > { %p10_p5 = scmp.ge.s32.totalorder %s13_s14, 26   ;;  %s1584_s13 = smov %s1586_s15 }
 0x11f   :  { %12 = sbr.rel (!%p10_p5) target bundleno = 2 (0x2), region = 68 }

</bundles_post_ra>
